<compile_context>
chip_gen: v6e
topology: v6e:2x2x1
jax: 0.10.0
libtpu: 0.0.40
codegen_flags: <defaults>
</compile_context>

<pallas_src>
from functools import partial

import jax
import jax.numpy as jnp
from jax.experimental import pallas as pl
from jax.experimental.pallas import tpu as pltpu


def _round_up(x, m):
    return ((x + m - 1) // m) * m


def _cdiv(a, b):
    return -(-a // b)


def _vmem_capacity_bytes():
    """Best-effort VMEM query; falls back to the conservative v7x figure."""
    try:
        return int(pltpu.get_tpu_info().vmem_capacity_bytes)
    except Exception:
        return 64 << 20


def _balanced_tile(dim, cap, align):
    """Tile <= ~cap that splits `dim` into near-equal, alignment-rounded blocks.

    Avoids the pathological padding of clamp-at-cap (e.g. M=264 with cap 256 ->
    tile 136, padded 272, instead of tile 256, padded 512)."""
    if dim <= cap:
        return _round_up(dim, align)
    nblk = _cdiv(dim, cap)
    return _round_up(_cdiv(dim, nblk), align)


def _pick_tiles(M, N, K, *, big_vmem, sublane):
    if big_vmem:
        # v5e / v6e / v5p: 128 MiB VMEM -> bigger tiles = fewer grid steps and
        # fewer gn/gm re-reads of x / weight (matters most on v5e's slower HBM).
        cap_m, cap_n, cap_k = 512, 1024, 2048
    else:
        # v7x: 64 MiB VMEM per TensorCore -> keep double-buffered working set small.
        cap_m, cap_n, cap_k = 256, 512, 1024
    tm = _balanced_tile(M, cap_m, sublane)
    tn = _balanced_tile(N, cap_n, 128)
    tk = _balanced_tile(K, cap_k, 128)
    return tm, tn, tk


def _noacc_kernel(*refs, has_bias):
    """Single K-block: one MXU pass, direct (lane-dense) store. Optional bias."""
    if has_bias:
        x_ref, w_ref, b_ref, o_ref = refs
    else:
        x_ref, w_ref, o_ref = refs
        b_ref = None
    out = jnp.dot(x_ref[...], w_ref[...], preferred_element_type=jnp.float32)
    if b_ref is not None:
        out = out + b_ref[...]
    o_ref[...] = out.astype(o_ref.dtype)


def _acc_kernel(*refs, has_bias, acc_in_out):
    """Multi K-block reduction.

    acc_in_out=True  -> f32 output: accumulate directly into the resident o_ref
                        block (no scratch, no final copy pass).
    acc_in_out=False -> non-f32 output: f32 VMEM scratch accumulator, cast at end.
    """
    if acc_in_out:
        if has_bias:
            x_ref, w_ref, b_ref, o_ref = refs
        else:
            x_ref, w_ref, o_ref = refs
            b_ref = None
        acc_ref = o_ref
    else:
        if has_bias:
            x_ref, w_ref, b_ref, o_ref, acc_ref = refs
        else:
            x_ref, w_ref, o_ref, acc_ref = refs
            b_ref = None

    k = pl.program_id(2)

    @pl.when(k == 0)
    def _():
        acc_ref[...] = jnp.zeros_like(acc_ref)

    acc_ref[...] += jnp.dot(x_ref[...], w_ref[...],
                            preferred_element_type=jnp.float32)

    if (b_ref is not None) or (not acc_in_out):
        @pl.when(k == pl.num_programs(2) - 1)
        def _():
            res = acc_ref[...]
            if b_ref is not None:
                res = res + b_ref[...]
            o_ref[...] = res.astype(o_ref.dtype)


def map_dense_forward(x, weight, bias=None, *, use_bf16=False,
                      tm=None, tn=None, tk=None, weight_buffers=2):
    """output = x @ weight + bias, computed by a Pallas TPU kernel.

    use_bf16=True is the throughput path (bf16 inputs, f32 accumulation): the cast
    happens wrapper-side so HBM traffic and VMEM tiles are already half-width.
    """
    M, K = x.shape
    K2, N = weight.shape
    assert K == K2, f"shape mismatch: x {x.shape} vs weight {weight.shape}"

    out_dtype = x.dtype
    has_bias = bias is not None

    # bf16 fast path: cast BEFORE padding / pallas_call (half HBM bytes, full MXU rate).
    if use_bf16:
        x = x.astype(jnp.bfloat16)
        weight = weight.astype(jnp.bfloat16)
    in_dtype = x.dtype
    sublane = 16 if in_dtype == jnp.bfloat16 else 8

    big_vmem = _vmem_capacity_bytes() >= (100 << 20)
    vmem_limit = (96 << 20) if big_vmem else (48 << 20)

    dtm, dtn, dtk = _pick_tiles(M, N, K, big_vmem=big_vmem, sublane=sublane)
    tm = _round_up(tm, sublane) if tm else dtm
    tn = _round_up(tn, 128) if tn else dtn
    tk = _round_up(tk, 128) if tk else dtk

    # Guarantee >= 2 parallel grid points so a second TensorCore (v7x / megacore)
    # is never idle when the problem allows a split.
    if _cdiv(M, tm) * _cdiv(N, tn) < 2:
        if N > 128:
            tn = _round_up(_cdiv(_round_up(N, 128), 2), 128)
        elif M > sublane:
            tm = _round_up(_cdiv(M, 2), sublane)

    # Zero-pad to tile multiples. K padding is required for correctness of the
    # reduction; M/N padding keeps stores lane-dense and MXU passes full. With
    # balanced tiles this is at most one alignment row/lane in the common case.
    Mp, Np, Kp = _round_up(M, tm), _round_up(N, tn), _round_up(K, tk)
    xp = x if (Mp == M and Kp == K) else jnp.pad(x, ((0, Mp - M), (0, Kp - K)))
    wp = weight if (Kp == K and Np == N) else jnp.pad(weight, ((0, Kp - K), (0, Np - N)))

    inputs = [xp, wp]
    if has_bias:
        bp = bias if Np == N else jnp.pad(bias, (0, Np - N))
        inputs.append(bp.reshape(1, Np))  # 2-D so the kernel sees a (1, tn) tile

    gm, gn, gk = Mp // tm, Np // tn, Kp // tk
    in_bpe = jnp.dtype(in_dtype).itemsize
    out_bpe = jnp.dtype(out_dtype).itemsize
    flops = 2 * Mp * Np * Kp

    # TODO(synk): optional fp8 weight path for v7x (fp8 weights, bf16 activations).

    if gk == 1:
        # Operand-residency-aware grid order: keep the bigger operand resident,
        # stream the smaller one through the inner grid axis.
        std_bytes = gm * Kp * Np + Mp * Kp   # i outer: x resident, weight streamed gm x
        swp_bytes = gn * Mp * Kp + Kp * Np   # j outer: weight resident, x streamed gn x
        if swp_bytes < std_bytes:
            grid = (gn, gm)
            x_map = lambda j, i: (i, 0)
            w_map = lambda j, i: (0, j)
            b_map = lambda j, i: (0, j)
            o_map = lambda j, i: (i, j)
            read_bytes = swp_bytes
        else:
            grid = (gm, gn)
            x_map = lambda i, j: (i, 0)
            w_map = lambda i, j: (0, j)
            b_map = lambda i, j: (0, j)
            o_map = lambda i, j: (i, j)
            read_bytes = std_bytes

        in_specs = [pl.BlockSpec((tm, Kp), x_map),
                    pl.BlockSpec((Kp, tn), w_map)]
        if has_bias:
            in_specs.append(pl.BlockSpec((1, tn), b_map))

        cost = pl.CostEstimate(
            flops=flops, transcendentals=0,
            bytes_accessed=in_bpe * read_bytes + out_bpe * Mp * Np)

        out = pl.pallas_call(
            partial(_noacc_kernel, has_bias=has_bias),
            out_shape=jax.ShapeDtypeStruct((Mp, Np), out_dtype),
            grid_spec=pltpu.PrefetchScalarGridSpec(
                num_scalar_prefetch=0,
                grid=grid,
                in_specs=in_specs,
                out_specs=pl.BlockSpec((tm, tn), o_map),
            ),
            compiler_params=pltpu.CompilerParams(
                dimension_semantics=("parallel", "parallel"),
                vmem_limit_bytes=vmem_limit),
            cost_estimate=cost,
        )(*inputs)
    else:
        acc_in_out = jnp.dtype(out_dtype) == jnp.dtype(jnp.float32)

        in_specs = [pl.BlockSpec((tm, tk), lambda i, j, k: (i, k))]
        # Deeper weight-stream buffering (mainly useful on v5e's slower HBM).
        if weight_buffers and weight_buffers > 2:
            in_specs.append(pl.BlockSpec((tk, tn), lambda i, j, k: (k, j),
                                         pipeline_mode=pl.Buffered(weight_buffers)))
        else:
            in_specs.append(pl.BlockSpec((tk, tn), lambda i, j, k: (k, j)))
        if has_bias:
            in_specs.append(pl.BlockSpec((1, tn), lambda i, j, k: (0, j)))

        scratch = [] if acc_in_out else [pltpu.VMEM((tm, tn), jnp.float32)]

        cost = pl.CostEstimate(
            flops=flops, transcendentals=0,
            bytes_accessed=in_bpe * (gn * Mp * Kp + gm * Kp * Np) + out_bpe * Mp * Np)

        out = pl.pallas_call(
            partial(_acc_kernel, has_bias=has_bias, acc_in_out=acc_in_out),
            out_shape=jax.ShapeDtypeStruct((Mp, Np), out_dtype),
            grid_spec=pltpu.PrefetchScalarGridSpec(
                num_scalar_prefetch=0,
                grid=(gm, gn, gk),
                in_specs=in_specs,
                out_specs=pl.BlockSpec((tm, tn), lambda i, j, k: (i, j)),
                scratch_shapes=scratch,
            ),
            compiler_params=pltpu.CompilerParams(
                dimension_semantics=("parallel", "parallel", "arbitrary"),
                vmem_limit_bytes=vmem_limit),
            cost_estimate=cost,
        )(*inputs)

    if Mp != M or Np != N:
        out = out[:M, :N]
    return out


def init_map_dense_params(key, in_features, out_features):
    """Mirror MAPDense.reset_parameters():
      kaiming_normal(weight, mode='fan_out') on an (in, out) tensor -> std = sqrt(2/in_features)
      bias ~ N(0, 0.01)
    """
    kw, kb = jax.random.split(key)
    std_w = jnp.sqrt(2.0 / in_features)
    weight = std_w * jax.random.normal(kw, (in_features, out_features), jnp.float32)
    bias = 0.01 * jax.random.normal(kb, (out_features,), jnp.float32)
    return weight, bias


if __name__ == "__main__":
    key = jax.random.PRNGKey(0)
    k_x, k_p, k_x2, k_p2, k_x3, k_p3 = jax.random.split(key, 6)

    # 1) Small demo (single K block, no-accumulator path), exact f32 numerics.
    batch, in_features, out_features = 8, 32, 32
    x = jax.random.normal(k_x, (batch, in_features), jnp.float32)
    weight, bias = init_map_dense_params(k_p, in_features, out_features)
    out = jax.block_until_ready(map_dense_forward(x, weight, bias))
    ref = x @ weight + bias[None, :]
    assert out.shape == (batch, out_features)
    assert jnp.allclose(out, ref, atol=1e-5, rtol=1e-5)

    # 2) Multi-K accumulator path (in-place f32 accumulation), N padding, and
    #    the >=2-parallel-grid-points split; plus the no-bias specialization.
    b2, in2, out2 = 16, 256, 160
    x2 = jax.random.normal(k_x2, (b2, in2), jnp.float32)
    w2, bi2 = init_map_dense_params(k_p2, in2, out2)
    ref2 = x2 @ w2 + bi2[None, :]
    out2a = jax.block_until_ready(map_dense_forward(x2, w2, bi2, tk=128))
    assert out2a.shape == (b2, out2)
    assert jnp.allclose(out2a, ref2, atol=1e-4, rtol=1e-4)
    out2b = jax.block_until_ready(map_dense_forward(x2, w2, None, tk=128))
    assert jnp.allclose(out2b, x2 @ w2, atol=1e-4, rtol=1e-4)

    # 3) Large-batch case exercising the residency-aware (swapped) grid order.
    b3, in3, out3 = 512, 128, 128
    x3 = jax.random.normal(k_x3, (b3, in3), jnp.float32)
    w3, bi3 = init_map_dense_params(k_p3, in3, out3)
    out3a = jax.block_until_ready(map_dense_forward(x3, w3, bi3))
    assert jnp.allclose(out3a, x3 @ w3 + bi3[None, :], atol=1e-4, rtol=1e-4)

    # 4) bf16 throughput path (wrapper-side cast, f32 accumulation) - loose tolerance.
    out_bf = jax.block_until_ready(map_dense_forward(x2, w2, bi2, use_bf16=True))
    assert jnp.allclose(out_bf, ref2, atol=5e-2, rtol=5e-2)

    print("KERNEL_OK")
</pallas_src>

<mosaic_0001>
module attributes {stable_mosaic.version = 11 : i64} {
  func.func @_noacc_kernel(%arg0: i32, %arg1: i32, %arg2: memref<8x128xf32, #tpu.memory_space<vmem>>, %arg3: memref<128x128xf32, #tpu.memory_space<vmem>>, %arg4: memref<1x128xf32, #tpu.memory_space<vmem>>, %arg5: memref<8x128xf32, #tpu.memory_space<vmem>>) attributes {dimension_semantics = [#tpu.dimension_semantics<parallel>, #tpu.dimension_semantics<parallel>], iteration_bounds = array<i64: 1, 1>, scalar_prefetch = 0 : i64, scratch_operands = 0 : i64, tpu.core_type = #tpu.core_type<tc>, window_params = [{transform_indices = @transform_0, window_bounds = array<i64: 8, 128>}, {transform_indices = @transform_1, window_bounds = array<i64: 128, 128>}, {transform_indices = @transform_2, window_bounds = array<i64: 1, 128>}, {transform_indices = @transform_3, window_bounds = array<i64: 8, 128>}]} {
    %c0 = arith.constant 0 : index
    %c0_0 = arith.constant 0 : index
    %0 = vector.load %arg2[%c0, %c0_0] : memref<8x128xf32, #tpu.memory_space<vmem>>, vector<8x128xf32>
    %c0_1 = arith.constant 0 : index
    %c0_2 = arith.constant 0 : index
    %1 = vector.load %arg3[%c0_1, %c0_2] : memref<128x128xf32, #tpu.memory_space<vmem>>, vector<128x128xf32>
    %cst = arith.constant dense<0.000000e+00> : vector<8x128xf32>
    %2 = tpu.matmul %0, %1, %cst {dimension_numbers = #tpu.dot_dimension_numbers<[1], [0], [0], [1], [0, 0, 1, 1], [], []>} : vector<8x128xf32>, vector<128x128xf32>, vector<8x128xf32> -> vector<8x128xf32>
    %c0_3 = arith.constant 0 : index
    %c0_4 = arith.constant 0 : index
    %3 = vector.load %arg4[%c0_3, %c0_4] : memref<1x128xf32, #tpu.memory_space<vmem>>, vector<1x128xf32>
    %4 = vector.broadcast %3 : vector<1x128xf32> to vector<8x128xf32>
    %5 = arith.addf %2, %4 : vector<8x128xf32>
    %c0_5 = arith.constant 0 : index
    %c0_6 = arith.constant 0 : index
    %6 = vector.load %arg5[%c0_5, %c0_6] : memref<8x128xf32, #tpu.memory_space<vmem>>, vector<8x128xf32>
    tpu.vector_store %arg5[%c0_5, %c0_6], %5 {strides = array<i32>} : memref<8x128xf32, #tpu.memory_space<vmem>>, vector<8x128xf32>,
    return
  }
  func.func @transform_0(%arg0: i32, %arg1: i32) -> (i32, i32) {
    %c0_i32 = arith.constant 0 : i32
    %c0_i32_0 = arith.constant 0 : i32
    return %arg0, %c0_i32 : i32, i32
  }
  func.func @transform_1(%arg0: i32, %arg1: i32) -> (i32, i32) {
    %c0_i32 = arith.constant 0 : i32
    %c0_i32_0 = arith.constant 0 : i32
    return %c0_i32, %arg1 : i32, i32
  }
  func.func @transform_2(%arg0: i32, %arg1: i32) -> (i32, i32) {
    %c0_i32 = arith.constant 0 : i32
    %c0_i32_0 = arith.constant 0 : i32
    return %c0_i32, %arg1 : i32, i32
  }
  func.func @transform_3(%arg0: i32, %arg1: i32) -> (i32, i32) {
    %c0_i32 = arith.constant 0 : i32
    return %arg0, %arg1 : i32, i32
  }
}

</mosaic_0001>

<bundles_post_ra>
// kernel: tpu_custom_call.1
= control target key start
LH: loop header
LB: loop body
LE: loop exit
PB: predicated region body
PF: predicated region fallthrough
CT: control target
= control target key end

     0   :  { %8 = vsyncpa [#allocation3], 0  ;;  %s317_s0 = inlined_call_operand.hbm [shape: f32[8,128], index: 0, kind: input, shape index: {}]   ;;  %s318_s1 = inlined_call_operand.hbm [shape: f32[128,128], index: 1, kind: input, shape index: {}]   ;;  %s319_s2 = inlined_call_operand.vmem [shape: f32[1,128], index: 2, kind: input, shape index: {}]   ;;  %s320_s3 = inlined_call_operand.hbm [shape: f32[8,128], index: 3, kind: output, shape index: {}]  }
   0x1   :  { %9 = vsyncpa [#allocation6], 0 }
   0x2   :  { %10 = vsyncpa [#allocation4], 0  ;;  %s278_s12 = smov [#allocation2]   ;;  %s279_s14 = smov [#allocation5]  }
   0x3   :  { %s17_s13 = sshll.u32 %s278_s12, 4  ;;  %s26_s15 = sshll.u32 %s279_s14, 4  ;;  %s18_s13 = int_to_ptr.vmem [resolvable:$true] %s17_s13  ;;  %s27_s15 = int_to_ptr.vmem [resolvable:$true] %s26_s15 }
   0x4   :  { %s220_s16 = scalar_lea.vmem %s18_s13, 128  ;;  %p225_p1 = scmp.lt.s32.totalorder %s18_s13, %s18_s13 }
   0x5   :  { %p221_p0 = scmp.ne.s32.totalorder %s18_s13, %s220_s16  ;;  %p226_p2 = scmp.lt.s32.totalorder %s220_s16, %s220_s16 }
   0x7   :  { %p227_p3 = por %p226_p2, %p225_p1 }
   0x9   :  { %p228_p4 = pnand %p227_p3, %p221_p0 }
   0xb   :  { %231 = shalt.err (!%p228_p4)
}
   0xc   :  { %20 = dma.hbm_to_vmem [thread:$0]  %s317_s0, 128, %s18_s13, [#allocation3]  }
   0xd   :  { %s240_s19 = scalar_lea.vmem %s27_s15, 2048  ;;  %p245_p6 = scmp.lt.s32.totalorder %s27_s15, %s27_s15 }
   0xe   :  { %p241_p5 = scmp.ne.s32.totalorder %s27_s15, %s240_s19  ;;  %p246_p7 = scmp.lt.s32.totalorder %s240_s19, %s240_s19 }
  0x10   :  { %p247_p8 = por %p246_p7, %p245_p6 }
  0x12   :  { %p248_p9 = pnand %p247_p8, %p241_p5 }
  0x14   :  { %251 = shalt.err (!%p248_p9)
}
  0x15   :  { %s280_s20 = smov 128   ;;  %s281_s21 = smov 8  }
  0x16   :  { %32 = dma.hbm_to_vmem [thread:$0]  %s318_s1, 2048, %s27_s15, [#allocation6], %s280_s20, %s280_s20, %s281_s21  }
  0x17   :  { %272 = dma.done.wait [#allocation3], 128  }
  0x18   :  { %273 = vsyncadd [#allocation3], 4294967168 }
  0x19   :  { %274 = dma.done.wait [#allocation6], 2048  }
  0x1a   :  { %275 = vsyncadd [#allocation6], 4294965248  ;;  %v282_v0 = vmov 0.0   ;;  %vm283_vm0 = vmmov 0   ;;  %v57_v1 = vld [vmem:[#allocation5 + $0x78] sm:$0xff]  ;;  %v56_v2 = vld [vmem:[#allocation5 + $0x70] sm:$0xff] }
  0x1b   :  { %170 = vmatprep.subr.mxu0 %v282_v0  ;;  %202 = vmatprep.mubr.msk.f32.mxu0 %vm283_vm0, %v282_v0  ;;  %v55_v3 = vld [vmem:[#allocation5 + $0x68] sm:$0xff]  ;;  %v54_v4 = vld [vmem:[#allocation5 + $0x60] sm:$0xff]  ;;  %v53_v5 = vld [vmem:[#allocation5 + $0x58] sm:$0xff]  ;;  %s284_s24 = smov [#allocation7]  }
  0x1c   :  { %171 = vmatpush3.msra.mxu0 %v57_v1  ;;  %v52_v6 = vld [vmem:[#allocation5 + $0x50] sm:$0xff]  ;;  %v51_v7 = vld [vmem:[#allocation5 + $0x48] sm:$0xff]  ;;  %v50_v8 = vld [vmem:[#allocation5 + $0x40] sm:$0xff]  ;;  %s142_s25 = sshll.u32 %s284_s24, 4  ;;  %s143_s25 = int_to_ptr.vmem [resolvable:$true] %s142_s25 }
  0x1d   :  { %172 = vmatprep.subr.mxu0 %v282_v0  ;;  %v49_v9 = vld [vmem:[#allocation5 + $0x38] sm:$0xff]  ;;  %v48_v10 = vld [vmem:[#allocation5 + $0x30] sm:$0xff]  ;;  %v47_v11 = vld [vmem:[#allocation5 + $0x28] sm:$0xff]  ;;  %s252_s26 = scalar_lea.vmem %s143_s25, 128  ;;  %p257_p11 = scmp.lt.s32.totalorder %s143_s25, %s143_s25 }
  0x1e   :  { %173 = vmatpush3.msra.mxu0 %v56_v2  ;;  %v46_v12 = vld [vmem:[#allocation5 + $0x20] sm:$0xff]  ;;  %v45_v13 = vld [vmem:[#allocation5 + $0x18] sm:$0xff]  ;;  %v44_v14 = vld [vmem:[#allocation5 + $0x10] sm:$0xff]  ;;  %p253_p10 = scmp.ne.s32.totalorder %s143_s25, %s252_s26  ;;  %p258_p12 = scmp.lt.s32.totalorder %s252_s26, %s252_s26 }
  0x1f   :  { %174 = vmatprep.subr.mxu0 %v282_v0  ;;  %v43_v15 = vld [vmem:[#allocation5 + $0x8] sm:$0xff]  ;;  %v42_v16 = vld [vmem:[#allocation5] sm:$0xff]  ;;  %v41_v17 = vld [vmem:[#allocation2] sm:$0xff] }
  0x20   :  { %175 = vmatpush3.msra.mxu0 %v55_v3  ;;  %v152_v18 = vld [vmem:[%s319_s2] ss:$0 sm:$0xff]  ;;  %p259_p13 = por %p258_p12, %p257_p11 }
  0x21   :  { %176 = vmatprep.subr.mxu0 %v282_v0 }
  0x22   :  { %177 = vmatpush3.msra.mxu0 %v54_v4  ;;  %p260_p0 = pnand %p259_p13, %p253_p10 }
  0x23   :  { %178 = vmatprep.subr.mxu0 %v282_v0 }
  0x24   :  { %179 = vmatpush3.msra.mxu0 %v53_v5 }
  0x25   :  { %180 = vmatprep.subr.mxu0 %v282_v0 }
  0x26   :  { %181 = vmatpush3.msra.mxu0 %v52_v6 }
  0x27   :  { %182 = vmatprep.subr.mxu0 %v282_v0 }
  0x28   :  { %183 = vmatpush3.msra.mxu0 %v51_v7 }
  0x29   :  { %184 = vmatprep.subr.mxu0 %v282_v0 }
  0x2a   :  { %185 = vmatpush3.msra.mxu0 %v50_v8 }
  0x2b   :  { %186 = vmatprep.subr.mxu0 %v282_v0 }
  0x2c   :  { %187 = vmatpush3.msra.mxu0 %v49_v9 }
  0x2d   :  { %188 = vmatprep.subr.mxu0 %v282_v0 }
  0x2e   :  { %189 = vmatpush3.msra.mxu0 %v48_v10 }
  0x2f   :  { %190 = vmatprep.subr.mxu0 %v282_v0 }
  0x30   :  { %191 = vmatpush3.msra.mxu0 %v47_v11 }
  0x31   :  { %192 = vmatprep.subr.mxu0 %v282_v0 }
  0x32   :  { %193 = vmatpush3.msra.mxu0 %v46_v12 }
  0x33   :  { %194 = vmatprep.subr.mxu0 %v282_v0 }
  0x34   :  { %195 = vmatpush3.msra.mxu0 %v45_v13 }
  0x35   :  { %196 = vmatprep.subr.mxu0 %v282_v0 }
  0x36   :  { %197 = vmatpush3.msra.mxu0 %v44_v14 }
  0x37   :  { %198 = vmatprep.subr.mxu0 %v282_v0 }
  0x38   :  { %199 = vmatpush3.msra.mxu0 %v43_v15 }
  0x39   :  { %200 = vmatprep.subr.mxu0 %v282_v0 }
  0x3a   :  { %201 = vmatpush3.msra.mxu0 %v42_v16 }
  0x3b   :  { %203 = vmatmul.mubr.f32.vlgmr.msra.gmra.mxu0 %v41_v17 }
  0xfb   :  { %v131_v19 = vpop.f32.mrf.mxu0 }
  0xfc   :  { %v132_v20 = vadd.f32 %v152_v18, %v131_v19 }
  0xfd   :  { %v204_v21 = vpop.f32.mrf.mxu0 }
  0xfe   :  { %135 = vst [vmem:[#allocation7] sm:$0xff] %v132_v20 }
  0xff   :  { %263 = shalt.err (!%p260_p0)
}
 0x100   :  { %145 = dma.vmem_to_hbm [thread:$0]  %s143_s25, 128, %s320_s3, [#allocation4]  }
 0x101   :  { %276 = dma.done.wait [#allocation4], 128  }
 0x102   :  { %277 = vsyncadd [#allocation4], 4294967168 }
 0x103   :  { %149 = vsyncpa [#allocation3], 1 }
 0x104   :  { %150 = vsyncpa [#allocation6], 1 }
 0x105   :  { %151 = vsyncpa [#allocation4], 1 }

</bundles_post_ra>
